<compile_context>
chip_gen: v5e
topology: v5e:2x2
jax: 0.10.0
libtpu: 0.0.40
codegen_flags: <defaults>
</compile_context>

<pallas_src>
from functools import partial

import jax
import jax.numpy as jnp
from jax.experimental import pallas as pl
from jax.experimental.pallas import tpu as pltpu


def predictor_kernel(x_ref, w_ref, b_ref, o_ref, acc_ref, *, inv_hw):
    t = pl.program_id(1)

    @pl.when(t == 0)
    def _init():
        acc_ref[...] = jnp.zeros_like(acc_ref)

    # ---- steady state: element-wise (VPU) accumulation, no cross-lane work ----
    hw_tile = x_ref.shape[-1]
    lanes = acc_ref.shape[-1]            # min(128, hw_tile)
    n_full = hw_tile // lanes
    rem = hw_tile - n_full * lanes

    acc = acc_ref[...]                   # (bt, C, lanes) f32
    for j in range(n_full):              # static unroll; aligned 128-lane slices
        acc += x_ref[:, :, j * lanes:(j + 1) * lanes].astype(jnp.float32)
    if rem:                              # only when HW itself is not a multiple of 128
        acc = acc.at[:, :, :rem].add(
            x_ref[:, :, n_full * lanes:].astype(jnp.float32))
    acc_ref[...] = acc

    # ---- finalize: one cross-lane reduce + linear head, once per batch block ----
    @pl.when(t == pl.num_programs(1) - 1)
    def _finalize():
        w = w_ref[...].astype(jnp.float32)                 # (C, 1)
        weighted = acc_ref[...] * w                        # (bt, C, lanes) VPU mul
        s = jnp.sum(weighted, axis=2, keepdims=True)       # (bt, C, 1)  lane reduce (once)
        s = jnp.sum(s, axis=1, keepdims=True)              # (bt, 1, 1)  sublane reduce (once)
        out = s * inv_hw + b_ref[0]                        # bias scalar from SMEM
        o_ref[...] = out.astype(o_ref.dtype)


def _pick_hw_tile(HW, C, itemsize, per_buffer_budget, max_chunks=32):
    """Spatial tile: a multiple of 128 dividing HW (or full HW), budget/unroll aware."""
    if HW % 128 != 0:
        # Only the full extent is a legal last block dim (cannot lane-tile cleanly).
        return HW
    cap = per_buffer_budget // max(1, C * itemsize)        # elements per pipeline buffer
    cap = min(cap, max_chunks * 128, HW)
    cap = max(128, (cap // 128) * 128)
    for t in range(cap, 0, -128):
        if HW % t == 0:
            return t
    return 128  # HW is a multiple of 128 here, so 128 always divides it (unreachable)


def _pick_batch_tile(N, C, hw_tile, itemsize, lanes, per_buffer_budget,
                     acc_budget=4 << 20):
    """Largest divisor of N whose x-block and accumulator fit the per-buffer budgets."""
    for bt in range(N, 0, -1):
        if N % bt:
            continue
        if (bt * C * hw_tile * itemsize <= per_buffer_budget
                and bt * C * lanes * 4 <= acc_budget):
            return bt
    return 1


def predictor_forward(x_nchw, weight, bias, *, per_buffer_budget_bytes=4 << 20):
    """x_nchw: (N, C, H, W). weight: (1, C) (PyTorch Linear layout). bias: (1,)."""
    N, C, H, W = x_nchw.shape
    HW = H * W

    x = x_nchw.reshape(N, C, HW)                 # free reshape (spatial contiguous)
    w_col = weight.reshape(C, 1)                 # (1, C) -> (C, 1)
    b1 = bias.reshape(1).astype(jnp.float32)     # SMEM scalar

    itemsize = x.dtype.itemsize
    hw_tile = _pick_hw_tile(HW, C, itemsize, per_buffer_budget_bytes)
    lanes = min(128, hw_tile)
    bt = _pick_batch_tile(N, C, hw_tile, itemsize, lanes, per_buffer_budget_bytes)

    num_b = N // bt
    num_t = HW // hw_tile

    # VMEM accounting: 2 double-buffered x tiles + accumulator + weight (+ slack).
    x_block_bytes = bt * C * hw_tile * itemsize
    acc_bytes = bt * C * lanes * 4
    w_bytes = 2 * C * 128 * 4                    # lane-padded (C, 1) block, double-buffered
    needed = 2 * x_block_bytes + acc_bytes + w_bytes + (2 << 20)
    # 32 MiB covers the v6e/v7x scoped defaults and raises v5e's 16 MiB default;
    # only forced full-extent blocks (HW not a multiple of 128, huge C*HW) push past it.
    vmem_limit = int(max(32 << 20, needed))

    kern = partial(predictor_kernel, inv_hw=1.0 / float(HW))

    out = pl.pallas_call(
        kern,
        out_shape=jax.ShapeDtypeStruct((N, 1, 1), x.dtype),
        grid_spec=pltpu.PrefetchScalarGridSpec(
            num_scalar_prefetch=0,
            grid=(num_b, num_t),
            in_specs=[
                pl.BlockSpec((bt, C, hw_tile), lambda n, t: (n, 0, t)),
                pl.BlockSpec((C, 1), lambda n, t: (0, 0)),
                pl.BlockSpec(memory_space=pltpu.MemorySpace.SMEM),
            ],
            out_specs=pl.BlockSpec((bt, 1, 1), lambda n, t: (n, 0, 0)),
            scratch_shapes=[pltpu.VMEM((bt, C, lanes), jnp.float32)],
        ),
        compiler_params=pltpu.CompilerParams(
            dimension_semantics=("parallel", "arbitrary"),
            vmem_limit_bytes=vmem_limit),
    )(x, w_col, b1)

    return out.reshape(N, 1)


def predictor_reference(x_nchw, weight, bias):
    """Plain-JAX reference mirroring the PyTorch module (for validation)."""
    pooled = jnp.mean(x_nchw, axis=(2, 3))                            # (N, C)
    return jnp.sum(pooled * weight, axis=1, keepdims=True) + bias     # (N, 1)


if __name__ == "__main__":
    key = jax.random.PRNGKey(0)
    k1, k2, k3 = jax.random.split(key, 3)

    N, C, H, W = 2, 384, 16, 16           # dim=384 matches the module default

    x = jax.random.normal(k1, (N, C, H, W), jnp.float32)
    # PyTorch Linear(dim, 1) parameter layout: weight (1, C), bias (1,)
    bound = 1.0 / (C ** 0.5)
    weight = jax.random.uniform(k2, (1, C), jnp.float32, -bound, bound)
    bias = jax.random.uniform(k3, (1,), jnp.float32, -bound, bound)

    out = jax.block_until_ready(predictor_forward(x, weight, bias))
    ref = predictor_reference(x, weight, bias)

    assert out.shape == (N, 1) and out.dtype == x.dtype
    err = float(jnp.max(jnp.abs(out - ref)))
    assert err < 1e-4, f"max abs error vs reference: {err}"
    print("KERNEL_OK")
</pallas_src>

<mosaic_0001>
module attributes {stable_mosaic.version = 11 : i64} {
  func.func @predictor_kernel(%arg0: i32, %arg1: i32, %arg2: memref<2x384x256xf32, #tpu.memory_space<vmem>>, %arg3: memref<384x1xf32, #tpu.memory_space<vmem>>, %arg4: memref<1xf32, #tpu.memory_space<smem>>, %arg5: memref<2x1x1xf32, #tpu.memory_space<vmem>>, %arg6: memref<2x384x128xf32, #tpu.memory_space<vmem>>) attributes {dimension_semantics = [#tpu.dimension_semantics<parallel>, #tpu.dimension_semantics<arbitrary>], iteration_bounds = array<i64: 1, 1>, scalar_prefetch = 0 : i64, scratch_operands = 1 : i64, tpu.core_type = #tpu.core_type<tc>, window_params = [{transform_indices = @transform_0, window_bounds = array<i64: 2, 384, 256>}, {pipeline_mode = #tpu.pipeline_mode<synchronous>, transform_indices = @transform_1, window_bounds = array<i64: 384, 1>}, {transform_indices = @transform_2, window_bounds = array<i64: 1>}, {transform_indices = @transform_3, window_bounds = array<i64: 2, 1, 1>}]} {
    %c0_i32 = arith.constant 0 : i32
    %0 = arith.cmpi eq, %arg1, %c0_i32 : i32
    %1 = arith.extui %0 : i1 to i32
    %c0_i32_0 = arith.constant 0 : i32
    %2 = arith.cmpi ne, %1, %c0_i32_0 : i32
    scf.if %2 {
      %cst = arith.constant 0.000000e+00 : f32
      %12 = vector.broadcast %cst : f32 to vector<2x384x128xf32>
      %c0_13 = arith.constant 0 : index
      %c0_14 = arith.constant 0 : index
      %c0_15 = arith.constant 0 : index
      %13 = vector.load %arg6[%c0_13, %c0_14, %c0_15] : memref<2x384x128xf32, #tpu.memory_space<vmem>>, vector<2x384x128xf32>
      tpu.vector_store %arg6[%c0_13, %c0_14, %c0_15], %12 {strides = array<i32>} : memref<2x384x128xf32, #tpu.memory_space<vmem>>, vector<2x384x128xf32>,
    } else {
    }
    %c0 = arith.constant 0 : index
    %c0_1 = arith.constant 0 : index
    %c0_2 = arith.constant 0 : index
    %3 = vector.load %arg6[%c0, %c0_1, %c0_2] : memref<2x384x128xf32, #tpu.memory_space<vmem>>, vector<2x384x128xf32>
    %c0_3 = arith.constant 0 : index
    %c0_4 = arith.constant 0 : index
    %c0_5 = arith.constant 0 : index
    %4 = vector.load %arg2[%c0_3, %c0_4, %c0_5] : memref<2x384x256xf32, #tpu.memory_space<vmem>>, vector<2x384x128xf32>
    %5 = arith.addf %3, %4 : vector<2x384x128xf32>
    %c0_6 = arith.constant 0 : index
    %c0_7 = arith.constant 0 : index
    %c128 = arith.constant 128 : index
    %6 = vector.load %arg2[%c0_6, %c0_7, %c128] : memref<2x384x256xf32, #tpu.memory_space<vmem>>, vector<2x384x128xf32>
    %7 = arith.addf %5, %6 : vector<2x384x128xf32>
    %c0_8 = arith.constant 0 : index
    %c0_9 = arith.constant 0 : index
    %c0_10 = arith.constant 0 : index
    %8 = vector.load %arg6[%c0_8, %c0_9, %c0_10] : memref<2x384x128xf32, #tpu.memory_space<vmem>>, vector<2x384x128xf32>
    tpu.vector_store %arg6[%c0_8, %c0_9, %c0_10], %7 {strides = array<i32>} : memref<2x384x128xf32, #tpu.memory_space<vmem>>, vector<2x384x128xf32>,
    %c0_i32_11 = arith.constant 0 : i32
    %9 = arith.cmpi eq, %arg1, %c0_i32_11 : i32
    %10 = arith.extui %9 : i1 to i32
    %c0_i32_12 = arith.constant 0 : i32
    %11 = arith.cmpi ne, %10, %c0_i32_12 : i32
    scf.if %11 {
      %c0_13 = arith.constant 0 : index
      %c0_14 = arith.constant 0 : index
      %12 = vector.load %arg3[%c0_13, %c0_14] : memref<384x1xf32, #tpu.memory_space<vmem>>, vector<384x1xf32>
      %c0_15 = arith.constant 0 : index
      %c0_16 = arith.constant 0 : index
      %c0_17 = arith.constant 0 : index
      %13 = vector.load %arg6[%c0_15, %c0_16, %c0_17] : memref<2x384x128xf32, #tpu.memory_space<vmem>>, vector<2x384x128xf32>
      %14 = vector.shape_cast %12 : vector<384x1xf32> to vector<1x384x1xf32>
      %15 = vector.broadcast %14 : vector<1x384x1xf32> to vector<2x384x128xf32>
      %16 = arith.mulf %13, %15 : vector<2x384x128xf32>
      %cst = arith.constant dense<0.000000e+00> : vector<2x384xf32>
      %17 = vector.multi_reduction <add>, %16, %cst [2] : vector<2x384x128xf32> to vector<2x384xf32>
      %18 = vector.shape_cast %17 : vector<2x384xf32> to vector<2x384x1xf32>
      %cst_18 = arith.constant dense<0.000000e+00> : vector<2x1xf32>
      %19 = vector.multi_reduction <add>, %18, %cst_18 [1] : vector<2x384x1xf32> to vector<2x1xf32>
      %20 = vector.shape_cast %19 : vector<2x1xf32> to vector<2x1x1xf32>
      %cst_19 = arith.constant 3.906250e-03 : f32
      %21 = vector.broadcast %cst_19 : f32 to vector<2x1x1xf32>
      %22 = arith.mulf %20, %21 : vector<2x1x1xf32>
      %c0_20 = arith.constant 0 : index
      %23 = memref.load %arg4[%c0_20] : memref<1xf32, #tpu.memory_space<smem>>
      %24 = vector.broadcast %23 : f32 to vector<2x1x1xf32>
      %25 = arith.addf %22, %24 : vector<2x1x1xf32>
      %c0_21 = arith.constant 0 : index
      %c0_22 = arith.constant 0 : index
      %c0_23 = arith.constant 0 : index
      %26 = vector.load %arg5[%c0_21, %c0_22, %c0_23] : memref<2x1x1xf32, #tpu.memory_space<vmem>>, vector<2x1x1xf32>
      tpu.vector_store %arg5[%c0_21, %c0_22, %c0_23], %25 {strides = array<i32>} : memref<2x1x1xf32, #tpu.memory_space<vmem>>, vector<2x1x1xf32>,
    } else {
    }
    return
  }
  func.func @transform_0(%arg0: i32, %arg1: i32) -> (i32, i32, i32) {
    %c0_i32 = arith.constant 0 : i32
    %c0_i32_0 = arith.constant 0 : i32
    return %arg0, %c0_i32, %arg1 : i32, i32, i32
  }
  func.func @transform_1(%arg0: i32, %arg1: i32) -> (i32, i32) {
    %c0_i32 = arith.constant 0 : i32
    %c0_i32_0 = arith.constant 0 : i32
    %c0_i32_1 = arith.constant 0 : i32
    return %c0_i32, %c0_i32_0 : i32, i32
  }
  func.func @transform_2(%arg0: i32, %arg1: i32) -> i32 {
    %c0_i32 = arith.constant 0 : i32
    %c0_i32_0 = arith.constant 0 : i32
    return %c0_i32 : i32
  }
  func.func @transform_3(%arg0: i32, %arg1: i32) -> (i32, i32, i32) {
    %c0_i32 = arith.constant 0 : i32
    %c0_i32_0 = arith.constant 0 : i32
    %c0_i32_1 = arith.constant 0 : i32
    return %arg0, %c0_i32, %c0_i32_0 : i32, i32, i32
  }
}

</mosaic_0001>

<bundles_post_ra>
// kernel: tpu_custom_call.1
= control target key start
LH: loop header
LB: loop body
LE: loop exit
PB: predicated region body
PF: predicated region fallthrough
CT: control target
= control target key end

     0   :  { %9 = vsyncpa [#allocation5], 0  ;;  %s1535_s15 = smov [#allocation4]   ;;  %s1536_s17 = smov 256   ;;  %s1910_s0 = inlined_call_operand.hbm [shape: f32[2,384,256], index: 0, kind: input, shape index: {}]   ;;  %s1911_s1 = inlined_call_operand.vmem [shape: f32[384,1], index: 1, kind: input, shape index: {}]   ;;  %s1912_s2 = inlined_call_operand.<no memory space> [shape: f32[1], index: 2, kind: input, shape index: {}]   ;;  %s1913_s3 = inlined_call_operand.vmem [shape: f32[2,1,1], index: 3, kind: output, shape index: {}]  }
   0x1   :  { %s14_s14 = sshll.u32 %s1910_s0, 4  ;;  %s16_s16 = sshll.u32 %s1535_s15, 4  ;;  %s15_s14 = int_to_ptr.hbm [resolvable:$true] %s14_s14  ;;  %s17_s16 = int_to_ptr.vmem [resolvable:$true] %s16_s16 }
   0x2   :  { %s1537_s18 = smov 16  }
   0x3   :  { %22 = dma.hbm_to_vmem [thread:$0]  %s15_s14, 24576, %s17_s16, [#allocation5], %s1536_s17, %s1536_s17, %s1537_s18  }
   0x4   :  { %1533 = dma.done.wait [#allocation5], 24576  }
   0x5   :  { %1534 = vsyncadd [#allocation5], 4294942720  ;;  %v1538_v0 = vmov 0   ;;  %v714_v1 = vld [vmem:[%s1911_s1 + $0x20] sm:$0xff]  ;;  %v712_v2 = vld [vmem:[%s1911_s1 + $0x10] sm:$0xff]  ;;  %vm1494_vm0 = vcmask 0  }
   0x6   :  { %1508 = vset.pattern.permute.xlu2 %v1538_v0  ;;  %1507 = vset.pattern.permute.xlu1 %v1538_v0  ;;  %v710_v3 = vld [vmem:[%s1911_s1] sm:$0xff]  ;;  %v715_v4 = vld [vmem:[%s1911_s1 + $0x28] sm:$0xff]  ;;  %v713_v5 = vld [vmem:[%s1911_s1 + $0x18] sm:$0xff] }
   0x7   :  { %1506 = vset.pattern.permute.xlu0 %v1538_v0  ;;  %876 = vperm.xlu2 %1508, %v714_v1   ;;  %v711_v6 = vld [vmem:[%s1911_s1 + $0x8] sm:$0xff]  ;;  %v718_v7 = vld [vmem:[%s1911_s1 + $0x40] sm:$0xff]  ;;  %v717_v8 = vld [vmem:[%s1911_s1 + $0x38] sm:$0xff] }
   0x8   :  { %866 = vperm.xlu1 %1507, %v712_v2   ;;  %856 = vperm.xlu0 %1506, %v710_v3   ;;  %v716_v9 = vld [vmem:[%s1911_s1 + $0x30] sm:$0xff]  ;;  %v721_v10 = vld [vmem:[%s1911_s1 + $0x58] sm:$0xff]  ;;  %v719_v12 = vld [vmem:[%s1911_s1 + $0x48] sm:$0xff] }
   0x9   :  { %v720_v11 = vld [vmem:[%s1911_s1 + $0x50] sm:$0xff]  ;;  %v723_v14 = vld [vmem:[%s1911_s1 + $0x68] sm:$0xff]  ;;  %v722_v15 = vld [vmem:[%s1911_s1 + $0x60] sm:$0xff] }
   0xa   :  { %v724_v13 = vld [vmem:[%s1911_s1 + $0x70] sm:$0xff]  ;;  %v727_v16 = vld [vmem:[%s1911_s1 + $0x88] sm:$0xff]  ;;  %v726_v17 = vld [vmem:[%s1911_s1 + $0x80] sm:$0xff] }
   0xb   :  { %v725_v18 = vld [vmem:[%s1911_s1 + $0x78] sm:$0xff]  ;;  %v730_v19 = vld [vmem:[%s1911_s1 + $0xa0] sm:$0xff]  ;;  %v728_v21 = vld [vmem:[%s1911_s1 + $0x90] sm:$0xff] }
   0xc   :  { %v729_v20 = vld [vmem:[%s1911_s1 + $0x98] sm:$0xff]  ;;  %v732_v23 = vld [vmem:[%s1911_s1 + $0xb0] sm:$0xff]  ;;  %v731_v24 = vld [vmem:[%s1911_s1 + $0xa8] sm:$0xff] }
   0xd   :  { %v733_v22 = vld [vmem:[%s1911_s1 + $0xb8] sm:$0xff]  ;;  %v736_v25 = vld [vmem:[%s1911_s1 + $0xd0] sm:$0xff]  ;;  %v735_v26 = vld [vmem:[%s1911_s1 + $0xc8] sm:$0xff] }
   0xe   :  { %v734_v27 = vld [vmem:[%s1911_s1 + $0xc0] sm:$0xff]  ;;  %v739_v28 = vld [vmem:[%s1911_s1 + $0xe8] sm:$0xff]  ;;  %v737_v30 = vld [vmem:[%s1911_s1 + $0xd8] sm:$0xff] }
   0xf   :  { %881 = vperm.xlu2 %1508, %v715_v4   ;;  %v738_v29 = vld [vmem:[%s1911_s1 + $0xe0] sm:$0xff]  ;;  %v741_v32 = vld [vmem:[%s1911_s1 + $0xf8] sm:$0xff]  ;;  %v740_v33 = vld [vmem:[%s1911_s1 + $0xf0] sm:$0xff] }
  0x10   :  { %871 = vperm.xlu1 %1507, %v713_v5   ;;  %861 = vperm.xlu0 %1506, %v711_v6   ;;  %v742_v31 = vld [vmem:[%s1911_s1 + $0x100] sm:$0xff]  ;;  %v745_v34 = vld [vmem:[%s1911_s1 + $0x118] sm:$0xff]  ;;  %v744_v35 = vld [vmem:[%s1911_s1 + $0x110] sm:$0xff] }
  0x11   :  { %v743_v36 = vld [vmem:[%s1911_s1 + $0x108] sm:$0xff]  ;;  %v748_v37 = vld [vmem:[%s1911_s1 + $0x130] sm:$0xff]  ;;  %v746_v39 = vld [vmem:[%s1911_s1 + $0x120] sm:$0xff] }
  0x12   :  { %v747_v38 = vld [vmem:[%s1911_s1 + $0x128] sm:$0xff]  ;;  %v750_v41 = vld [vmem:[%s1911_s1 + $0x140] sm:$0xff]  ;;  %v749_v42 = vld [vmem:[%s1911_s1 + $0x138] sm:$0xff] }
  0x13   :  { %v751_v40 = vld [vmem:[%s1911_s1 + $0x148] sm:$0xff]  ;;  %v754_v43 = vld [vmem:[%s1911_s1 + $0x160] sm:$0xff]  ;;  %v753_v44 = vld [vmem:[%s1911_s1 + $0x158] sm:$0xff] }
  0x14   :  { %v752_v45 = vld [vmem:[%s1911_s1 + $0x150] sm:$0xff]  ;;  %v757_v46 = vld [vmem:[%s1911_s1 + $0x178] sm:$0xff]  ;;  %v755_v49 = vld [vmem:[%s1911_s1 + $0x168] sm:$0xff] }
  0x15   :  { %v756_v47 = vld [vmem:[%s1911_s1 + $0x170] sm:$0xff]  ;;  %v229_v61 = vld [vmem:[#allocation4 + $0x20] sm:$0xff]  ;;  %v421_v62 = vld [vmem:[#allocation4 + $0x28] sm:$0xff] }
  0x16   :  { %v228_v63 = vld [vmem:[#allocation4 + $0x10] sm:$0xff]  ;;  %v420_v0 = vld [vmem:[#allocation4 + $0x18] sm:$0xff]  ;;  %v227_v1 = vld [vmem:[#allocation4] sm:$0xff]  ;;  %v517_v3 = vadd.f32 %v421_v62, %v229_v61 }
  0x17   :  { %896 = vperm.xlu2 %1508, %v718_v7   ;;  %v419_v2 = vld [vmem:[#allocation4 + $0x8] sm:$0xff]  ;;  %v516_v4 = vadd.f32 %v420_v0, %v228_v63 }
  0x18   :  { %891 = vperm.xlu1 %1507, %v717_v8   ;;  %886 = vperm.xlu0 %1506, %v716_v9   ;;  %v515_v5 = vadd.f32 %v419_v2, %v227_v1  ;;  %v239_v1 = vld [vmem:[#allocation4 + $0xc0] sm:$0xff]  ;;  %v431_v2 = vld [vmem:[#allocation4 + $0xc8] sm:$0xff] }
  0x1f   :  { %911 = vperm.xlu2 %1508, %v721_v10  }
  0x20   :  { %906 = vperm.xlu1 %1507, %v720_v11   ;;  %901 = vperm.xlu0 %1506, %v719_v12   ;;  %v230_v11 = vld [vmem:[#allocation4 + $0x30] sm:$0xff]  ;;  %v422_v12 = vld [vmem:[#allocation4 + $0x38] sm:$0xff] }
  0x27   :  { %926 = vperm.xlu2 %1508, %v724_v13  }
  0x28   :  { %921 = vperm.xlu1 %1507, %v723_v14   ;;  %916 = vperm.xlu0 %1506, %v722_v15   ;;  %v232_v14 = vld [vmem:[#allocation4 + $0x50] sm:$0xff]  ;;  %v424_v15 = vld [vmem:[#allocation4 + $0x58] sm:$0xff] }
  0x2f   :  { %941 = vperm.xlu2 %1508, %v727_v16   ;;  %v231_v16 = vld [vmem:[#allocation4 + $0x40] sm:$0xff] }
  0x30   :  { %936 = vperm.xlu1 %1507, %v726_v17   ;;  %931 = vperm.xlu0 %1506, %v725_v18   ;;  %v423_v17 = vld [vmem:[#allocation4 + $0x48] sm:$0xff]  ;;  %v518_v18 = vadd.f32 %v422_v12, %v230_v11  ;;  %v527_v11 = vadd.f32 %v431_v2, %v239_v1  ;;  %v248_v1 = vld [vmem:[#allocation4 + $0x150] sm:$0xff]  ;;  %v440_v2 = vld [vmem:[#allocation4 + $0x158] sm:$0xff] }
  0x37   :  { %956 = vperm.xlu2 %1508, %v730_v19   ;;  %v520_v19 = vadd.f32 %v424_v15, %v232_v14 }
  0x38   :  { %951 = vperm.xlu1 %1507, %v729_v20   ;;  %946 = vperm.xlu0 %1506, %v728_v21   ;;  %v519_v20 = vadd.f32 %v423_v17, %v231_v16 }
  0x3f   :  { %971 = vperm.xlu2 %1508, %v733_v22  }
  0x40   :  { %966 = vperm.xlu1 %1507, %v732_v23   ;;  %961 = vperm.xlu0 %1506, %v731_v24   ;;  %v233_v24 = vld [vmem:[#allocation4 + $0x60] sm:$0xff] }
  0x47   :  { %986 = vperm.xlu2 %1508, %v736_v25   ;;  %v425_v25 = vld [vmem:[#allocation4 + $0x68] sm:$0xff] }
  0x48   :  { %981 = vperm.xlu1 %1507, %v735_v26   ;;  %976 = vperm.xlu0 %1506, %v734_v27  }
  0x4f   :  { %1001 = vperm.xlu2 %1508, %v739_v28   ;;  %v235_v28 = vld [vmem:[#allocation4 + $0x80] sm:$0xff] }
  0x50   :  { %996 = vperm.xlu1 %1507, %v738_v29   ;;  %991 = vperm.xlu0 %1506, %v737_v30   ;;  %v427_v29 = vld [vmem:[#allocation4 + $0x88] sm:$0xff] }
  0x57   :  { %1016 = vperm.xlu2 %1508, %v742_v31   ;;  %v234_v31 = vld [vmem:[#allocation4 + $0x70] sm:$0xff] }
  0x58   :  { %1011 = vperm.xlu1 %1507, %v741_v32   ;;  %1006 = vperm.xlu0 %1506, %v740_v33   ;;  %v426_v32 = vld [vmem:[#allocation4 + $0x78] sm:$0xff]  ;;  %v521_v33 = vadd.f32 %v425_v25, %v233_v24  ;;  %v243_v25 = vld [vmem:[#allocation4 + $0x100] sm:$0xff] }
  0x59   :  { %v436_v24 = vld [vmem:[#allocation4 + $0x118] sm:$0xff] }
  0x5f   :  { %1031 = vperm.xlu2 %1508, %v745_v34   ;;  %v523_v34 = vadd.f32 %v427_v29, %v235_v28 }
  0x60   :  { %1026 = vperm.xlu1 %1507, %v744_v35   ;;  %1021 = vperm.xlu0 %1506, %v743_v36   ;;  %v522_v35 = vadd.f32 %v426_v32, %v234_v31 }
  0x61   :  { %v1703_v48 = vpop.permute.xlu2 %876 }
  0x62   :  { %v1098_v27 = vmul.f32 %v1703_v48, %v519_v20  ;;  %v434_v20 = vld [vmem:[#allocation4 + $0xf8] sm:$0xff] }
  0x67   :  { %1046 = vperm.xlu2 %1508, %v748_v37  }
  0x68   :  { %1041 = vperm.xlu1 %1507, %v747_v38   ;;  %1036 = vperm.xlu0 %1506, %v746_v39   ;;  %v236_v38 = vld [vmem:[#allocation4 + $0x90] sm:$0xff]  ;;  %v428_v39 = vld [vmem:[#allocation4 + $0x98] sm:$0xff] }
  0x69   :  { %v1712_v52 = vpop.permute.xlu2 %881 }
  0x6a   :  { %v1099_v23 = vmul.f32 %v1712_v52, %v520_v19  ;;  %v242_v19 = vld [vmem:[#allocation4 + $0xf0] sm:$0xff] }
  0x6b   :  { %v530_v28 = vadd.f32 %v434_v20, %v242_v19 }
  0x6f   :  { %1061 = vperm.xlu2 %1508, %v751_v40  }
  0x70   :  { %1056 = vperm.xlu1 %1507, %v750_v41   ;;  %1051 = vperm.xlu0 %1506, %v749_v42   ;;  %v238_v41 = vld [vmem:[#allocation4 + $0xb0] sm:$0xff]  ;;  %v430_v42 = vld [vmem:[#allocation4 + $0xb8] sm:$0xff] }
  0x71   :  { %v1718_v55 = vpop.permute.xlu2 %896  ;;  %v526_v61 = vadd.f32 %v430_v42, %v238_v41  ;;  %v439_v41 = vld [vmem:[#allocation4 + $0x148] sm:$0xff]  ;;  %v246_v42 = vld [vmem:[#allocation4 + $0x130] sm:$0xff] }
  0x72   :  { %v1102_v37 = vmul.f32 %v1718_v55, %v523_v34 }
  0x77   :  { %1076 = vperm.xlu2 %1508, %v754_v43  }
  0x78   :  { %1071 = vperm.xlu1 %1507, %v753_v44   ;;  %1066 = vperm.xlu0 %1506, %v752_v45   ;;  %v237_v44 = vld [vmem:[#allocation4 + $0xa0] sm:$0xff]  ;;  %v429_v45 = vld [vmem:[#allocation4 + $0xa8] sm:$0xff] }
  0x79   :  { %v1724_v58 = vpop.permute.xlu2 %911  ;;  %v525_v62 = vadd.f32 %v429_v45, %v237_v44  ;;  %v438_v44 = vld [vmem:[#allocation4 + $0x138] sm:$0xff] }
  0x7a   :  { %v1708_v50 = vpop.permute.xlu1 %866  ;;  %v1710_v51 = vpop.permute.xlu0 %856  ;;  %v1105_v0 = vmul.f32 %v1724_v58, %v526_v61  ;;  %v534_v61 = vadd.f32 %v438_v44, %v246_v42  ;;  %v254_v42 = vld [vmem:[#allocation4 + $0x1b0] sm:$0xff]  ;;  %v446_v44 = vld [vmem:[#allocation4 + $0x1b8] sm:$0xff] }
  0x7b   :  { %v1096_v8 = vmul.f32 %v1708_v50, %v517_v3  ;;  %v1094_v13 = vmul.f32 %v1710_v51, %v515_v5  ;;  %v433_v5 = vld [vmem:[#allocation4 + $0xe8] sm:$0xff] }
  0x7f   :  { %1091 = vperm.xlu2 %1508, %v757_v46  }
  0x80   :  { %1086 = vperm.xlu1 %1507, %v756_v47   ;;  %1081 = vperm.xlu0 %1506, %v755_v49   ;;  %v524_v47 = vadd.f32 %v428_v39, %v236_v38  ;;  %v437_v38 = vld [vmem:[#allocation4 + $0x128] sm:$0xff] }
  0x81   :  { %v1730_v6 = vpop.permute.xlu2 %926 }
  0x82   :  { %v1714_v53 = vpop.permute.xlu1 %871  ;;  %v1716_v54 = vpop.permute.xlu0 %861 }
  0x83   :  { %v1095_v10 = vmul.f32 %v1716_v54, %v516_v4  ;;  %v1097_v21 = vmul.f32 %v1714_v53, %v518_v18  ;;  %v241_v4 = vld [vmem:[#allocation4 + $0xe0] sm:$0xff] }
  0x89   :  { %v1740_v22 = vpop.permute.xlu2 %941 }
  0x8a   :  { %v1720_v56 = vpop.permute.xlu1 %891  ;;  %v1722_v57 = vpop.permute.xlu0 %886 }
  0x8b   :  { %v1100_v36 = vmul.f32 %v1722_v57, %v521_v33  ;;  %v1101_v40 = vmul.f32 %v1720_v56, %v522_v35 }
  0x91   :  { %v1751_v43 = vpop.permute.xlu2 %956 }
  0x92   :  { %v1726_v59 = vpop.permute.xlu1 %906  ;;  %v1728_v60 = vpop.permute.xlu0 %901 }
  0x93   :  { %v1103_v63 = vmul.f32 %v1728_v60, %v524_v47  ;;  %v1104_v3 = vmul.f32 %v1726_v59, %v525_v62 }
  0x99   :  { %v1760_v12 = vpop.permute.xlu2 %971 }
  0x9a   :  { %v1732_v7 = vpop.permute.xlu1 %921  ;;  %v1735_v9 = vpop.permute.xlu0 %916 }
  0x9b   :  { %v1106_v17 = vmul.f32 %v1735_v9, %v527_v11  ;;  %v249_v11 = vld [vmem:[#allocation4 + $0x160] sm:$0xff] }
  0xa1   :  { %v1769_v32 = vpop.permute.xlu2 %986 }
  0xa2   :  { %v1743_v26 = vpop.permute.xlu1 %936  ;;  %v1746_v30 = vpop.permute.xlu0 %931 }
  0xa3   :  { %v1109_v34 = vmul.f32 %v1746_v30, %v530_v28 }
  0xa8   :  { %1194 = vadd.xlane.f32.xlu2 %v1096_v8  ;;  %v240_v8 = vld [vmem:[#allocation4 + $0xd0] sm:$0xff] }
  0xaa   :  { %1192 = vadd.xlane.f32.xlu1 %v1095_v10  ;;  %1190 = vadd.xlane.f32.xlu0 %v1094_v13  ;;  %v1753_v46 = vpop.permute.xlu1 %951  ;;  %v1755_v49 = vpop.permute.xlu0 %946  ;;  %v432_v10 = vld [vmem:[#allocation4 + $0xd8] sm:$0xff]  ;;  %v529_v13 = vadd.f32 %v433_v5, %v241_v4  ;;  %v250_v5 = vld [vmem:[#allocation4 + $0x170] sm:$0xff] }
  0xab   :  { %v528_v15 = vadd.f32 %v432_v10, %v240_v8  ;;  %v1113_v4 = vmul.f32 %v1753_v46, %v534_v61  ;;  %v442_v8 = vld [vmem:[#allocation4 + $0x178] sm:$0xff] }
  0xac   :  { %v1108_v18 = vmul.f32 %v1730_v6, %v529_v13  ;;  %v441_v13 = vld [vmem:[#allocation4 + $0x168] sm:$0xff]  ;;  %v448_v61 = vld [vmem:[#allocation4 + $0x1d8] sm:$0xff] }
  0xb0   :  { %1196 = vadd.xlane.f32.xlu2 %v1097_v21  ;;  %v1107_v21 = vmul.f32 %v1732_v7, %v528_v15  ;;  %v536_v15 = vadd.f32 %v440_v2, %v248_v1  ;;  %v542_v1 = vadd.f32 %v446_v44, %v254_v42  ;;  %v452_v42 = vld [vmem:[#allocation4 + $0x218] sm:$0xff] }
  0xb2   :  { %1200 = vadd.xlane.f32.xlu1 %v1099_v23  ;;  %1198 = vadd.xlane.f32.xlu0 %v1098_v27  ;;  %v1762_v14 = vpop.permute.xlu1 %966  ;;  %v1764_v16 = vpop.permute.xlu0 %961  ;;  %v244_v23 = vld [vmem:[#allocation4 + $0x110] sm:$0xff]  ;;  %v435_v27 = vld [vmem:[#allocation4 + $0x108] sm:$0xff] }
  0xb3   :  { %v532_v29 = vadd.f32 %v436_v24, %v244_v23  ;;  %v531_v31 = vadd.f32 %v435_v27, %v243_v25  ;;  %v1115_v19 = vmul.f32 %v1764_v16, %v536_v15  ;;  %v443_v23 = vld [vmem:[#allocation4 + $0x188] sm:$0xff]  ;;  %v253_v25 = vld [vmem:[#allocation4 + $0x1a0] sm:$0xff] }
  0xb4   :  { %v445_v27 = vld [vmem:[#allocation4 + $0x1a8] sm:$0xff] }
  0xb5   :  { %v1110_v39 = vmul.f32 %v1743_v26, %v531_v31  ;;  %v444_v31 = vld [vmem:[#allocation4 + $0x198] sm:$0xff] }
  0xb8   :  { %1202 = vadd.xlane.f32.xlu2 %v1100_v36  ;;  %v1111_v36 = vmul.f32 %v1740_v22, %v532_v29  ;;  %v252_v29 = vld [vmem:[#allocation4 + $0x190] sm:$0xff] }
  0xba   :  { %1206 = vadd.xlane.f32.xlu1 %v1102_v37  ;;  %1204 = vadd.xlane.f32.xlu0 %v1101_v40  ;;  %v1771_v33 = vpop.permute.xlu1 %981  ;;  %v1774_v35 = vpop.permute.xlu0 %976  ;;  %v245_v37 = vld [vmem:[#allocation4 + $0x120] sm:$0xff] }
  0xbb   :  { %v247_v40 = vld [vmem:[#allocation4 + $0x140] sm:$0xff]  ;;  %v533_v45 = vadd.f32 %v437_v38, %v245_v37  ;;  %v541_v38 = vadd.f32 %v445_v27, %v253_v25 }
  0xbc   :  { %v535_v47 = vadd.f32 %v439_v41, %v247_v40 }
  0xbd   :  { %v1112_v62 = vmul.f32 %v1755_v49, %v533_v45  ;;  %v1120_v41 = vmul.f32 %v1769_v32, %v541_v38 }
  0xc0   :  { %1208 = vadd.xlane.f32.xlu2 %v1103_v63  ;;  %v1779_v63 = vpop.permute.xlu2 %1001 }
  0xc2   :  { %1212 = vadd.xlane.f32.xlu1 %v1105_v0  ;;  %1210 = vadd.xlane.f32.xlu0 %v1104_v3  ;;  %v1114_v0 = vmul.f32 %v1751_v43, %v535_v47  ;;  %v1782_v3 = vpop.permute.xlu1 %996  ;;  %v1785_v10 = vpop.permute.xlu0 %991  ;;  %v256_v47 = vld [vmem:[#allocation4 + $0x1d0] sm:$0xff] }
  0xc8   :  { %1214 = vadd.xlane.f32.xlu2 %v1106_v17  ;;  %v538_v17 = vadd.f32 %v442_v8, %v250_v5  ;;  %v1790_v28 = vpop.permute.xlu2 %1016 }
  0xca   :  { %1218 = vadd.xlane.f32.xlu1 %v1108_v18  ;;  %1216 = vadd.xlane.f32.xlu0 %v1107_v21  ;;  %v537_v18 = vadd.f32 %v441_v13, %v249_v11  ;;  %v1117_v20 = vmul.f32 %v1760_v12, %v538_v17  ;;  %v251_v21 = vld [vmem:[#allocation4 + $0x180] sm:$0xff]  ;;  %v1794_v37 = vpop.permute.xlu0 %1006  ;;  %v1121_v13 = vmul.f32 %v1785_v10, %v542_v1 }
  0xcb   :  { %v257_v17 = vld [vmem:[#allocation4 + $0x1e0] sm:$0xff] }
  0xcc   :  { %v1116_v24 = vmul.f32 %v1762_v14, %v537_v18  ;;  %v449_v18 = vld [vmem:[#allocation4 + $0x1e8] sm:$0xff] }
  0xcd   :  { %v545_v25 = vadd.f32 %v449_v18, %v257_v17  ;;  %v263_v17 = vld [vmem:[#allocation4 + $0x240] sm:$0xff]  ;;  %v455_v18 = vld [vmem:[#allocation4 + $0x248] sm:$0xff] }
  0xcf   :  { %v1124_v38 = vmul.f32 %v1794_v37, %v545_v25  ;;  %v264_v25 = vld [vmem:[#allocation4 + $0x250] sm:$0xff] }
  0xd0   :  { %1220 = vadd.xlane.f32.xlu2 %v1109_v34  ;;  %v1792_v34 = vpop.permute.xlu1 %1011  ;;  %v1799_v2 = vpop.permute.xlu2 %1031 }
  0xd2   :  { %1224 = vadd.xlane.f32.xlu1 %v1111_v36  ;;  %1222 = vadd.xlane.f32.xlu0 %v1110_v39  ;;  %v539_v36 = vadd.f32 %v443_v23, %v251_v21  ;;  %v540_v39 = vadd.f32 %v444_v31, %v252_v29  ;;  %v1803_v11 = vpop.permute.xlu0 %1021  ;;  %v451_v21 = vld [vmem:[#allocation4 + $0x208] sm:$0xff]  ;;  %v258_v23 = vld [vmem:[#allocation4 + $0x1f0] sm:$0xff] }
  0xd4   :  { %v1118_v40 = vmul.f32 %v1774_v35, %v539_v36  ;;  %v1119_v45 = vmul.f32 %v1771_v33, %v540_v39 }
  0xd8   :  { %1226 = vadd.xlane.f32.xlu2 %v1112_v62  ;;  %v255_v62 = vld [vmem:[#allocation4 + $0x1c0] sm:$0xff]  ;;  %v1801_v5 = vpop.permute.xlu1 %1026  ;;  %v1808_v31 = vpop.permute.xlu2 %1046 }
  0xda   :  { %1230 = vadd.xlane.f32.xlu1 %v1114_v0  ;;  %1228 = vadd.xlane.f32.xlu0 %v1113_v4  ;;  %v447_v0 = vld [vmem:[#allocation4 + $0x1c8] sm:$0xff]  ;;  %v544_v4 = vadd.f32 %v448_v61, %v256_v47  ;;  %v1813_v39 = vpop.permute.xlu0 %1036  ;;  %v454_v47 = vld [vmem:[#allocation4 + $0x238] sm:$0xff]  ;;  %v261_v61 = vld [vmem:[#allocation4 + $0x220] sm:$0xff] }
  0xdb   :  { %v543_v8 = vadd.f32 %v447_v0, %v255_v62  ;;  %v453_v62 = vld [vmem:[#allocation4 + $0x228] sm:$0xff] }
  0xdc   :  { %v1123_v15 = vmul.f32 %v1779_v63, %v544_v4  ;;  %v549_v4 = vadd.f32 %v453_v62, %v261_v61  ;;  %v268_v61 = vld [vmem:[#allocation4 + $0x290] sm:$0xff]  ;;  %v460_v62 = vld [vmem:[#allocation4 + $0x298] sm:$0xff] }
  0xe0   :  { %1232 = vadd.xlane.f32.xlu2 %v1115_v19  ;;  %v1122_v19 = vmul.f32 %v1782_v3, %v543_v8  ;;  %v1810_v36 = vpop.permute.xlu1 %1041 }
  0xe2   :  { %1236 = vadd.xlane.f32.xlu1 %v1117_v20  ;;  %1234 = vadd.xlane.f32.xlu0 %v1116_v24  ;;  %v259_v20 = vld [vmem:[#allocation4 + $0x200] sm:$0xff]  ;;  %v450_v24 = vld [vmem:[#allocation4 + $0x1f8] sm:$0xff] }
  0xe3   :  { %v547_v27 = vadd.f32 %v451_v21, %v259_v20  ;;  %v546_v29 = vadd.f32 %v450_v24, %v258_v23  ;;  %v1128_v20 = vmul.f32 %v1801_v5, %v549_v4  ;;  %v265_v21 = vld [vmem:[#allocation4 + $0x260] sm:$0xff]  ;;  %v457_v23 = vld [vmem:[#allocation4 + $0x268] sm:$0xff]  ;;  %v1824_v24 = vpop.permute.xlu0 %1051 }
  0xe4   :  { %v459_v4 = vld [vmem:[#allocation4 + $0x288] sm:$0xff] }
  0xe5   :  { %v1125_v44 = vmul.f32 %v1792_v34, %v546_v29  ;;  %v551_v29 = vadd.f32 %v455_v18, %v263_v17  ;;  %v556_v18 = vadd.f32 %v460_v62, %v268_v61 }
  0xe8   :  { %1238 = vadd.xlane.f32.xlu2 %v1118_v40  ;;  %v1126_v40 = vmul.f32 %v1790_v28, %v547_v27  ;;  %v456_v27 = vld [vmem:[#allocation4 + $0x258] sm:$0xff] }
  0xea   :  { %1242 = vadd.xlane.f32.xlu1 %v1120_v41  ;;  %1240 = vadd.xlane.f32.xlu0 %v1119_v45  ;;  %v260_v41 = vld [vmem:[#allocation4 + $0x210] sm:$0xff] }
  0xeb   :  { %v262_v45 = vld [vmem:[#allocation4 + $0x230] sm:$0xff]  ;;  %v548_v0 = vadd.f32 %v452_v42, %v260_v41  ;;  %v1130_v41 = vmul.f32 %v1813_v39, %v551_v29  ;;  %v1833_v17 = vpop.permute.xlu0 %1066 }
  0xec   :  { %v550_v1 = vadd.f32 %v454_v47, %v262_v45  ;;  %v458_v45 = vld [vmem:[#allocation4 + $0x278] sm:$0xff]  ;;  %1923 = vst [vmem:[#allocation10_spill] sm:$0xff] %v1833_v17 }
  0xed   :  { %v1127_v8 = vmul.f32 %v1803_v11, %v548_v0 }
  0xf0   :  { %1244 = vadd.xlane.f32.xlu2 %v1121_v13  ;;  %v1818_v13 = vpop.permute.xlu2 %1061 }
  0xf1   :  { %1920 = vst [vmem:[#allocation7_spill] sm:$0xff] %v1818_v13 }
  0xf2   :  { %1248 = vadd.xlane.f32.xlu1 %v1123_v15  ;;  %1246 = vadd.xlane.f32.xlu0 %v1122_v19  ;;  %v1129_v15 = vmul.f32 %v1799_v2, %v550_v1  ;;  %v1821_v19 = vpop.permute.xlu1 %1056  ;;  %v267_v1 = vld [vmem:[#allocation4 + $0x280] sm:$0xff] }
  0xf8   :  { %1250 = vadd.xlane.f32.xlu2 %v1124_v38  ;;  %v553_v38 = vadd.f32 %v457_v23, %v265_v21  ;;  %v1829_v0 = vpop.permute.xlu2 %1076  ;;  %v1135_v23 = vmul.f32 %v1818_v13, %v556_v18  ;;  %v272_v18 = vld [vmem:[#allocation4 + $0x2d0] sm:$0xff]  ;;  %v471_v13 = vld [vmem:[#allocation4 + $0x348] sm:$0xff] }
  0xf9   :  { %1921 = vst [vmem:[#allocation8_spill] sm:$0xff] %v1829_v0 }
  0xfa   :  { %1254 = vadd.xlane.f32.xlu1 %v1126_v40  ;;  %1252 = vadd.xlane.f32.xlu0 %v1125_v44  ;;  %v552_v40 = vadd.f32 %v456_v27, %v264_v25  ;;  %v1132_v42 = vmul.f32 %v1808_v31, %v553_v38  ;;  %v266_v44 = vld [vmem:[#allocation4 + $0x270] sm:$0xff]  ;;  %v269_v25 = vld [vmem:[#allocation4 + $0x2a0] sm:$0xff]  ;;  %v461_v27 = vld [vmem:[#allocation4 + $0x2a8] sm:$0xff] }
  0xfb   :  { %v271_v38 = vld [vmem:[#allocation4 + $0x2c0] sm:$0xff] }
  0xfc   :  { %v1131_v47 = vmul.f32 %v1810_v36, %v552_v40  ;;  %v463_v40 = vld [vmem:[#allocation4 + $0x2c8] sm:$0xff] }
 0x100   :  { %1256 = vadd.xlane.f32.xlu2 %v1127_v8  ;;  %v1831_v8 = vpop.permute.xlu1 %1071 }
 0x101   :  { %1922 = vst [vmem:[#allocation9_spill] sm:$0xff] %v1831_v8 }
 0x102   :  { %1260 = vadd.xlane.f32.xlu1 %v1129_v15  ;;  %1258 = vadd.xlane.f32.xlu0 %v1128_v20  ;;  %v554_v15 = vadd.f32 %v458_v45, %v266_v44  ;;  %v555_v20 = vadd.f32 %v459_v4, %v267_v1  ;;  %v557_v44 = vadd.f32 %v461_v27, %v269_v25  ;;  %v1838_v45 = vpop.permute.xlu2 %1091  ;;  %v1842_v1 = vpop.permute.xlu0 %1081  ;;  %v275_v25 = vld [vmem:[#allocation4 + $0x300] sm:$0xff]  ;;  %v467_v27 = vld [vmem:[#allocation4 + $0x308] sm:$0xff] }
 0x103   :  { %1924 = vst [vmem:[#allocation11_spill] sm:$0xff] %v1838_v45  ;;  %v563_v45 = vadd.f32 %v467_v27, %v275_v25 }
 0x104   :  { %v1133_v21 = vmul.f32 %v1824_v24, %v554_v15  ;;  %v1134_v29 = vmul.f32 %v1821_v19, %v555_v20  ;;  %v1136_v4 = vmul.f32 %v1833_v17, %v557_v44  ;;  %v464_v20 = vld [vmem:[#allocation4 + $0x2d8] sm:$0xff]  ;;  %v469_v17 = vld [vmem:[#allocation4 + $0x328] sm:$0xff] }
 0x108   :  { %1262 = vadd.xlane.f32.xlu2 %v1130_v41  ;;  %v270_v41 = vld [vmem:[#allocation4 + $0x2b0] sm:$0xff]  ;;  %v1840_v61 = vpop.permute.xlu1 %1086 }
 0x109   :  { %1925 = vst [vmem:[#allocation12_spill] sm:$0xff] %v1840_v61 }
 0x10a   :  { %1266 = vadd.xlane.f32.xlu1 %v1132_v42  ;;  %1264 = vadd.xlane.f32.xlu0 %v1131_v47  ;;  %v462_v42 = vld [vmem:[#allocation4 + $0x2b8] sm:$0xff]  ;;  %v559_v47 = vadd.f32 %v463_v40, %v271_v38  ;;  %v560_v38 = vadd.f32 %v464_v20, %v272_v18  ;;  %v278_v18 = vld [vmem:[#allocation4 + $0x330] sm:$0xff] }
 0x10b   :  { %v558_v62 = vadd.f32 %v462_v42, %v270_v41  ;;  %v470_v20 = vld [vmem:[#allocation4 + $0x338] sm:$0xff] }
 0x10c   :  { %v1138_v15 = vmul.f32 %v1829_v0, %v559_v47  ;;  %v1139_v47 = vmul.f32 %v1842_v1, %v560_v38  ;;  %v566_v27 = vadd.f32 %v470_v20, %v278_v18 }
 0x110   :  { %1268 = vadd.xlane.f32.xlu2 %v1133_v21  ;;  %v1137_v21 = vmul.f32 %v1831_v8, %v558_v62  ;;  %v279_v8 = vld [vmem:[#allocation4 + $0x340] sm:$0xff] }
 0x112   :  { %1272 = vadd.xlane.f32.xlu1 %v1135_v23  ;;  %1270 = vadd.xlane.f32.xlu0 %v1134_v29  ;;  %v276_v23 = vld [vmem:[#allocation4 + $0x310] sm:$0xff]  ;;  %v468_v29 = vld [vmem:[#allocation4 + $0x318] sm:$0xff] }
 0x113   :  { %v564_v41 = vadd.f32 %v468_v29, %v276_v23  ;;  %v567_v29 = vadd.f32 %v471_v13, %v279_v8  ;;  %v473_v13 = vld [vmem:[#allocation4 + $0x368] sm:$0xff] }
 0x115   :  { %v1143_v0 = vmul.f32 %v1716_v54, %v564_v41 }
 0x118   :  { %1274 = vadd.xlane.f32.xlu2 %v1136_v4  ;;  %v277_v4 = vld [vmem:[#allocation4 + $0x320] sm:$0xff] }
 0x11a   :  { %1278 = vadd.xlane.f32.xlu1 %v1138_v15  ;;  %1276 = vadd.xlane.f32.xlu0 %v1137_v21  ;;  %v1142_v15 = vmul.f32 %v1710_v51, %v563_v45  ;;  %v565_v21 = vadd.f32 %v469_v17, %v277_v4  ;;  %v472_v51 = vld [vmem:[#allocation4 + $0x358] sm:$0xff]  ;;  %v281_v17 = vld [vmem:[#allocation4 + $0x360] sm:$0xff] }
 0x11b   :  { %v1195_v40 = vpop.xlane.xlu2 %1194 }
 0x11c   :  { %v1144_v41 = vmul.f32 %v1708_v50, %v565_v21  ;;  %v569_v50 = vadd.f32 %v473_v13, %v281_v17  ;;  %v478_v13 = vld [vmem:[#allocation4 + $0x3b8] sm:$0xff] }
 0x11d   :  { %v1193_v42 = vpop.xlane.xlu1 %1192  ;;  %v1191_v61 = vpop.xlane.xlu0 %1190 }
 0x11e   :  { %v1382_v44 = vadd.f32 %v1193_v42, %v1191_v61  ;;  %v280_v42 = vld [vmem:[#allocation4 + $0x350] sm:$0xff] }
 0x11f   :  { %v568_v8 = vadd.f32 %v472_v51, %v280_v42 }
 0x120   :  { %v1383_v62 = vadd.f32 %v1382_v44, %v1195_v40  ;;  %1280 = vadd.xlane.f32.xlu2 %v1139_v47  ;;  %v1146_v40 = vmul.f32 %v1703_v48, %v567_v29  ;;  %v282_v44 = vld [vmem:[#allocation4 + $0x370] sm:$0xff]  ;;  %v474_v47 = vld [vmem:[#allocation4 + $0x378] sm:$0xff]  ;;  %v475_v29 = vld [vmem:[#allocation4 + $0x388] sm:$0xff] }
 0x121   :  { %v1147_v21 = vmul.f32 %v1712_v52, %v568_v8 }
 0x122   :  { %1288 = vadd.xlane.f32.xlu1 %v1143_v0  ;;  %1286 = vadd.xlane.f32.xlu0 %v1142_v15  ;;  %v1145_v0 = vmul.f32 %v1714_v53, %v566_v27  ;;  %v283_v53 = vld [vmem:[#allocation4 + $0x380] sm:$0xff] }
 0x123   :  { %v1197_v23 = vpop.xlane.xlu2 %1196  ;;  %v285_v27 = vld [vmem:[#allocation4 + $0x3a0] sm:$0xff] }
 0x124   :  { %v1384_v61 = vadd.f32 %v1383_v62, %v1197_v23  ;;  %v570_v62 = vadd.f32 %v474_v47, %v282_v44 }
 0x125   :  { %v1201_v25 = vpop.xlane.xlu1 %1200  ;;  %v1199_v38 = vpop.xlane.xlu0 %1198 }
 0x126   :  { %v1385_v54 = vadd.f32 %v1384_v61, %v1199_v38  ;;  %v1149_v23 = vmul.f32 %v1720_v56, %v570_v62  ;;  %v1148_v61 = vmul.f32 %v1722_v57, %v569_v50  ;;  %v477_v38 = vld [vmem:[#allocation4 + $0x3a8] sm:$0xff]  ;;  %v286_v57 = vld [vmem:[#allocation4 + $0x3b0] sm:$0xff] }
 0x127   :  { %v573_v51 = vadd.f32 %v477_v38, %v285_v27  ;;  %v288_v62 = vld [vmem:[#allocation4 + $0x3d0] sm:$0xff]  ;;  %v479_v50 = vld [vmem:[#allocation4 + $0x3c8] sm:$0xff] }
 0x128   :  { %1290 = vadd.xlane.f32.xlu2 %v1144_v41  ;;  %v1386_v45 = vadd.f32 %v1385_v54, %v1201_v25  ;;  %v284_v54 = vld [vmem:[#allocation4 + $0x390] sm:$0xff]  ;;  %v476_v41 = vld [vmem:[#allocation4 + $0x398] sm:$0xff]  ;;  %v481_v27 = vld [vmem:[#allocation4 + $0x3e8] sm:$0xff] }
 0x129   :  { %v572_v52 = vadd.f32 %v476_v41, %v284_v54  ;;  %v1152_v17 = vmul.f32 %v1726_v59, %v573_v51  ;;  %v291_v41 = vld [vmem:[#allocation4 + $0x400] sm:$0xff]  ;;  %v482_v51 = vld [vmem:[#allocation4 + $0x3f8] sm:$0xff] }
 0x12a   :  { %1294 = vadd.xlane.f32.xlu1 %v1146_v40  ;;  %1292 = vadd.xlane.f32.xlu0 %v1145_v0  ;;  %v571_v40 = vadd.f32 %v475_v29, %v283_v53 }
 0x12b   :  { %v1203_v4 = vpop.xlane.xlu2 %1202  ;;  %v1151_v8 = vmul.f32 %v1728_v60, %v572_v52  ;;  %v289_v60 = vld [vmem:[#allocation4 + $0x3e0] sm:$0xff] }
 0x12c   :  { %v1387_v15 = vadd.f32 %v1386_v45, %v1203_v4  ;;  %v1150_v47 = vmul.f32 %v1718_v55, %v571_v40  ;;  %v483_v40 = vld [vmem:[#allocation4 + $0x408] sm:$0xff] }
 0x12d   :  { %v1207_v18 = vpop.xlane.xlu1 %1206  ;;  %v1205_v20 = vpop.xlane.xlu0 %1204  ;;  %v579_v52 = vadd.f32 %v483_v40, %v291_v41  ;;  %v488_v41 = vld [vmem:[#allocation4 + $0x458] sm:$0xff] }
 0x12e   :  { %v1388_v48 = vadd.f32 %v1387_v15, %v1205_v20  ;;  %v480_v15 = vld [vmem:[#allocation4 + $0x3d8] sm:$0xff]  ;;  %v574_v20 = vadd.f32 %v478_v13, %v286_v57 }
 0x12f   :  { %v1158_v57 = vmul.f32 %v1743_v26, %v579_v52  ;;  %v484_v13 = vld [vmem:[#allocation4 + $0x418] sm:$0xff] }
 0x130   :  { %1296 = vadd.xlane.f32.xlu2 %v1147_v21  ;;  %v1389_v25 = vadd.f32 %v1388_v48, %v1207_v18  ;;  %v287_v18 = vld [vmem:[#allocation4 + $0x3c0] sm:$0xff]  ;;  %v576_v21 = vadd.f32 %v480_v15, %v288_v62  ;;  %v294_v62 = vld [vmem:[#allocation4 + $0x430] sm:$0xff]  ;;  %v486_v15 = vld [vmem:[#allocation4 + $0x438] sm:$0xff] }
 0x131   :  { %v575_v55 = vadd.f32 %v479_v50, %v287_v18  ;;  %v293_v18 = vld [vmem:[#allocation4 + $0x420] sm:$0xff]  ;;  %v485_v50 = vld [vmem:[#allocation4 + $0x428] sm:$0xff] }
 0x132   :  { %1300 = vadd.xlane.f32.xlu1 %v1149_v23  ;;  %1298 = vadd.xlane.f32.xlu0 %v1148_v61  ;;  %v1153_v61 = vmul.f32 %v1724_v58, %v574_v20 }
 0x133   :  { %v1209_v42 = vpop.xlane.xlu2 %1208  ;;  %v1154_v38 = vmul.f32 %v1735_v9, %v575_v55  ;;  %v292_v9 = vld [vmem:[#allocation4 + $0x410] sm:$0xff] }
 0x134   :  { %v1390_v0 = vadd.f32 %v1389_v25, %v1209_v42  ;;  %v1155_v25 = vmul.f32 %v1732_v7, %v576_v21  ;;  %v290_v42 = vld [vmem:[#allocation4 + $0x3f0] sm:$0xff]  ;;  %v580_v20 = vadd.f32 %v484_v13, %v292_v9  ;;  %v582_v21 = vadd.f32 %v486_v15, %v294_v62  ;;  %v299_v9 = vld [vmem:[#allocation4 + $0x480] sm:$0xff]  ;;  %v491_v13 = vld [vmem:[#allocation4 + $0x488] sm:$0xff] }
 0x135   :  { %v1213_v45 = vpop.xlane.xlu1 %1212  ;;  %v1211_v44 = vpop.xlane.xlu0 %1210  ;;  %v578_v58 = vadd.f32 %v482_v51, %v290_v42 }
 0x136   :  { %v1391_v56 = vadd.f32 %v1390_v0, %v1211_v44  ;;  %v577_v0 = vadd.f32 %v481_v27, %v289_v60  ;;  %v297_v27 = vld [vmem:[#allocation4 + $0x460] sm:$0xff] }
 0x138   :  { %1302 = vadd.xlane.f32.xlu2 %v1150_v47  ;;  %v1392_v4 = vadd.f32 %v1391_v56, %v1213_v45 }
 0x13a   :  { %1306 = vadd.xlane.f32.xlu1 %v1152_v17  ;;  %1304 = vadd.xlane.f32.xlu0 %v1151_v8  ;;  %v1156_v17 = vmul.f32 %v1730_v6, %v577_v0  ;;  %v1157_v8 = vmul.f32 %v1746_v30, %v578_v58  ;;  %v581_v6 = vadd.f32 %v485_v50, %v293_v18  ;;  %v295_v30 = vld [vmem:[#allocation4 + $0x440] sm:$0xff]  ;;  %v490_v58 = vld [vmem:[#allocation4 + $0x478] sm:$0xff] }
 0x13b   :  { %v1215_v48 = vpop.xlane.xlu2 %1214 }
 0x13c   :  { %v1393_v23 = vadd.f32 %v1392_v4, %v1215_v48 }
 0x13d   :  { %v1219_v53 = vpop.xlane.xlu1 %1218  ;;  %v1217_v29 = vpop.xlane.xlu0 %1216 }
 0x13e   :  { %v1394_v59 = vadd.f32 %v1393_v23, %v1217_v29  ;;  %v1159_v29 = vmul.f32 %v1740_v22, %v580_v20 }
 0x140   :  { %1308 = vadd.xlane.f32.xlu2 %v1153_v61  ;;  %v1395_v54 = vadd.f32 %v1394_v59, %v1219_v53  ;;  %v1161_v59 = vmul.f32 %v1753_v46, %v582_v21  ;;  %v487_v61 = vld [vmem:[#allocation4 + $0x448] sm:$0xff] }
 0x141   :  { %v583_v40 = vadd.f32 %v487_v61, %v295_v30  ;;  %v493_v21 = vld [vmem:[#allocation4 + $0x4a8] sm:$0xff] }
 0x142   :  { %1312 = vadd.xlane.f32.xlu1 %v1155_v25  ;;  %1310 = vadd.xlane.f32.xlu0 %v1154_v38  ;;  %v1160_v25 = vmul.f32 %v1755_v49, %v581_v6  ;;  %v489_v38 = vld [vmem:[#allocation4 + $0x468] sm:$0xff]  ;;  %v298_v49 = vld [vmem:[#allocation4 + $0x470] sm:$0xff]  ;;  %v303_v6 = vld [vmem:[#allocation4 + $0x4c0] sm:$0xff] }
 0x143   :  { %v1221_v45 = vpop.xlane.xlu2 %1220  ;;  %v585_v51 = vadd.f32 %v489_v38, %v297_v27 }
 0x144   :  { %v1396_v44 = vadd.f32 %v1395_v54, %v1221_v45  ;;  %v296_v54 = vld [vmem:[#allocation4 + $0x450] sm:$0xff] }
 0x145   :  { %v1225_v56 = vpop.xlane.xlu1 %1224  ;;  %v1223_v47 = vpop.xlane.xlu0 %1222  ;;  %v584_v22 = vadd.f32 %v488_v41, %v296_v54  ;;  %v496_v41 = vld [vmem:[#allocation4 + $0x4d8] sm:$0xff] }
 0x146   :  { %v1397_v7 = vadd.f32 %v1396_v44, %v1223_v47  ;;  %v1162_v44 = vmul.f32 %v1751_v43, %v583_v40  ;;  %v587_v43 = vadd.f32 %v491_v13, %v299_v9  ;;  %v309_v13 = vld [vmem:[#allocation4 + $0x520] sm:$0xff] }
 0x147   :  { %v1163_v47 = vmul.f32 %v1764_v16, %v584_v22  ;;  %v301_v16 = vld [vmem:[#allocation4 + $0x4a0] sm:$0xff]  ;;  %v497_v22 = vld [vmem:[#allocation4 + $0x4e8] sm:$0xff] }
 0x148   :  { %1314 = vadd.xlane.f32.xlu2 %v1156_v17  ;;  %v1398_v4 = vadd.f32 %v1397_v7, %v1225_v56  ;;  %v1164_v56 = vmul.f32 %v1762_v14, %v585_v51  ;;  %v300_v17 = vld [vmem:[#allocation4 + $0x490] sm:$0xff] }
 0x149   :  { %v306_v51 = vld [vmem:[#allocation4 + $0x4f0] sm:$0xff] }
 0x14a   :  { %1318 = vadd.xlane.f32.xlu1 %v1158_v57  ;;  %1316 = vadd.xlane.f32.xlu0 %v1157_v8  ;;  %v492_v57 = vld [vmem:[#allocation4 + $0x498] sm:$0xff]  ;;  %v586_v8 = vadd.f32 %v490_v58, %v298_v49 }
 0x14b   :  { %v1227_v48 = vpop.xlane.xlu2 %1226  ;;  %v588_v62 = vadd.f32 %v492_v57, %v300_v17  ;;  %v499_v17 = vld [vmem:[#allocation4 + $0x508] sm:$0xff] }
 0x14c   :  { %v1399_v23 = vadd.f32 %v1398_v4, %v1227_v48  ;;  %v1165_v20 = vmul.f32 %v1760_v12, %v586_v8  ;;  %v501_v8 = vld [vmem:[#allocation4 + $0x528] sm:$0xff] }
 0x14d   :  { %v1231_v53 = vpop.xlane.xlu1 %1230  ;;  %v1229_v55 = vpop.xlane.xlu0 %1228  ;;  %v1167_v48 = vmul.f32 %v1771_v33, %v588_v62  ;;  %v500_v62 = vld [vmem:[#allocation4 + $0x518] sm:$0xff] }
 0x14e   :  { %v1400_v26 = vadd.f32 %v1399_v23, %v1229_v55  ;;  %v1166_v23 = vmul.f32 %v1774_v35, %v587_v43  ;;  %v495_v55 = vld [vmem:[#allocation4 + $0x4c8] sm:$0xff]  ;;  %v304_v35 = vld [vmem:[#allocation4 + $0x4d0] sm:$0xff]  ;;  %v597_v43 = vadd.f32 %v501_v8, %v309_v13 }
 0x14f   :  { %v591_v61 = vadd.f32 %v495_v55, %v303_v6  ;;  %v312_v6 = vld [vmem:[#allocation4 + $0x550] sm:$0xff]  ;;  %v504_v55 = vld [vmem:[#allocation4 + $0x558] sm:$0xff] }
 0x150   :  { %1320 = vadd.xlane.f32.xlu2 %v1159_v29  ;;  %v1401_v60 = vadd.f32 %v1400_v26, %v1231_v53  ;;  %v302_v26 = vld [vmem:[#allocation4 + $0x4b0] sm:$0xff]  ;;  %v494_v29 = vld [vmem:[#allocation4 + $0x4b8] sm:$0xff] }
 0x151   :  { %v590_v12 = vadd.f32 %v494_v29, %v302_v26  ;;  %v1170_v54 = vmul.f32 %v1782_v3, %v591_v61  ;;  %v311_v26 = vld [vmem:[#allocation4 + $0x540] sm:$0xff]  ;;  %v503_v29 = vld [vmem:[#allocation4 + $0x548] sm:$0xff]  ;;  %v600_v61 = vadd.f32 %v504_v55, %v312_v6 }
 0x152   :  { %1324 = vadd.xlane.f32.xlu1 %v1161_v59  ;;  %1322 = vadd.xlane.f32.xlu0 %v1160_v25  ;;  %v589_v59 = vadd.f32 %v493_v21, %v301_v16  ;;  %v1176_v16 = vmul.f32 %v1801_v5, %v597_v43  ;;  %v502_v21 = vld [vmem:[#allocation4 + $0x538] sm:$0xff]  ;;  %v1927_v43 = vld [vmem:[#allocation9_spill] sm:$0xff] }
 0x153   :  { %v1233_v42 = vpop.xlane.xlu2 %1232  ;;  %v1169_v40 = vmul.f32 %v1785_v10, %v590_v12  ;;  %v307_v10 = vld [vmem:[#allocation4 + $0x500] sm:$0xff] }
 0x154   :  { %v1402_v0 = vadd.f32 %v1401_v60, %v1233_v42  ;;  %v1168_v38 = vmul.f32 %v1769_v32, %v589_v59 }
 0x155   :  { %v1237_v45 = vpop.xlane.xlu1 %1236  ;;  %v1235_v52 = vpop.xlane.xlu0 %1234 }
 0x156   :  { %v1403_v46 = vadd.f32 %v1402_v0, %v1235_v52  ;;  %v498_v0 = vld [vmem:[#allocation4 + $0x4f8] sm:$0xff]  ;;  %v592_v52 = vadd.f32 %v496_v41, %v304_v35  ;;  %v315_v41 = vld [vmem:[#allocation4 + $0x580] sm:$0xff] }
 0x158   :  { %1326 = vadd.xlane.f32.xlu2 %v1162_v44  ;;  %v1404_v7 = vadd.f32 %v1403_v46, %v1237_v45  ;;  %v305_v45 = vld [vmem:[#allocation4 + $0x4e0] sm:$0xff]  ;;  %v594_v44 = vadd.f32 %v498_v0, %v306_v51  ;;  %v506_v51 = vld [vmem:[#allocation4 + $0x578] sm:$0xff] }
 0x159   :  { %v593_v32 = vadd.f32 %v497_v22, %v305_v45 }
 0x15a   :  { %1330 = vadd.xlane.f32.xlu1 %v1164_v56  ;;  %1328 = vadd.xlane.f32.xlu0 %v1163_v47  ;;  %v1171_v47 = vmul.f32 %v1779_v63, %v592_v52 }
 0x15b   :  { %v1239_v4 = vpop.xlane.xlu2 %1238  ;;  %v1172_v57 = vmul.f32 %v1794_v37, %v593_v32  ;;  %v310_v37 = vld [vmem:[#allocation4 + $0x530] sm:$0xff]  ;;  %v508_v32 = vld [vmem:[#allocation4 + $0x598] sm:$0xff] }
 0x15c   :  { %v1405_v15 = vadd.f32 %v1404_v7, %v1239_v4  ;;  %v1173_v7 = vmul.f32 %v1792_v34, %v594_v44  ;;  %v308_v4 = vld [vmem:[#allocation4 + $0x510] sm:$0xff]  ;;  %v598_v59 = vadd.f32 %v502_v21, %v310_v37  ;;  %v512_v21 = vld [vmem:[#allocation4 + $0x5d8] sm:$0xff] }
 0x15d   :  { %v1243_v18 = vpop.xlane.xlu1 %1242  ;;  %v1241_v50 = vpop.xlane.xlu0 %1240  ;;  %v596_v63 = vadd.f32 %v500_v62, %v308_v4  ;;  %v320_v37 = vld [vmem:[#allocation4 + $0x5d0] sm:$0xff] }
 0x15e   :  { %v1406_v14 = vadd.f32 %v1405_v15, %v1241_v50  ;;  %v595_v15 = vadd.f32 %v499_v17, %v307_v10  ;;  %v317_v10 = vld [vmem:[#allocation4 + $0x5a0] sm:$0xff]  ;;  %v509_v17 = vld [vmem:[#allocation4 + $0x5a8] sm:$0xff] }
 0x160   :  { %1332 = vadd.xlane.f32.xlu2 %v1165_v20  ;;  %v1407_v53 = vadd.f32 %v1406_v14, %v1243_v18 }
 0x162   :  { %1336 = vadd.xlane.f32.xlu1 %v1167_v48  ;;  %1334 = vadd.xlane.f32.xlu0 %v1166_v23  ;;  %v1174_v48 = vmul.f32 %v1790_v28, %v595_v15  ;;  %v1175_v23 = vmul.f32 %v1803_v11, %v596_v63  ;;  %v599_v28 = vadd.f32 %v503_v29, %v311_v26  ;;  %v313_v11 = vld [vmem:[#allocation4 + $0x560] sm:$0xff]  ;;  %v1928_v63 = vld [vmem:[#allocation10_spill] sm:$0xff] }
 0x163   :  { %v1245_v30 = vpop.xlane.xlu2 %1244  ;;  %v1926_v15 = vld [vmem:[#allocation7_spill] sm:$0xff]  ;;  %v608_v29 = vadd.f32 %v512_v21, %v320_v37 }
 0x164   :  { %v1408_v25 = vadd.f32 %v1407_v53, %v1245_v30 }
 0x165   :  { %v1249_v60 = vpop.xlane.xlu1 %1248  ;;  %v1247_v27 = vpop.xlane.xlu0 %1246 }
 0x166   :  { %v1409_v33 = vadd.f32 %v1408_v25, %v1247_v27  ;;  %v1177_v27 = vmul.f32 %v1799_v2, %v598_v59 }
 0x168   :  { %1338 = vadd.xlane.f32.xlu2 %v1168_v38  ;;  %v1410_v42 = vadd.f32 %v1409_v33, %v1249_v60  ;;  %v1179_v33 = vmul.f32 %v1810_v36, %v600_v61  ;;  %v505_v38 = vld [vmem:[#allocation4 + $0x568] sm:$0xff] }
 0x169   :  { %v601_v0 = vadd.f32 %v505_v38, %v313_v11  ;;  %v274_v11 = vld [vmem:[#allocation4 + $0x2f0] sm:$0xff]  ;;  %v466_v38 = vld [vmem:[#allocation4 + $0x2f8] sm:$0xff] }
 0x16a   :  { %1342 = vadd.xlane.f32.xlu1 %v1170_v54  ;;  %1340 = vadd.xlane.f32.xlu0 %v1169_v40  ;;  %v1178_v54 = vmul.f32 %v1813_v39, %v599_v28  ;;  %v507_v40 = vld [vmem:[#allocation4 + $0x588] sm:$0xff]  ;;  %v316_v39 = vld [vmem:[#allocation4 + $0x590] sm:$0xff]  ;;  %v321_v28 = vld [vmem:[#allocation4 + $0x5e0] sm:$0xff] }
 0x16b   :  { %v1251_v46 = vpop.xlane.xlu2 %1250  ;;  %v603_v22 = vadd.f32 %v507_v40, %v315_v41 }
 0x16c   :  { %v1411_v56 = vadd.f32 %v1410_v42, %v1251_v46  ;;  %v314_v42 = vld [vmem:[#allocation4 + $0x570] sm:$0xff] }
 0x16d   :  { %v1255_v49 = vpop.xlane.xlu1 %1254  ;;  %v1253_v58 = vpop.xlane.xlu0 %1252  ;;  %v602_v2 = vadd.f32 %v506_v51, %v314_v42 }
 0x16e   :  { %v1412_v3 = vadd.f32 %v1411_v56, %v1253_v58  ;;  %v1180_v56 = vmul.f32 %v1808_v31, %v601_v0  ;;  %v605_v31 = vadd.f32 %v509_v17, %v317_v10  ;;  %v562_v0 = vadd.f32 %v466_v38, %v274_v11 }
 0x16f   :  { %v1181_v58 = vmul.f32 %v1824_v24, %v602_v2  ;;  %v319_v24 = vld [vmem:[#allocation4 + $0x5c0] sm:$0xff] }
 0x170   :  { %1344 = vadd.xlane.f32.xlu2 %v1171_v47  ;;  %v1413_v9 = vadd.f32 %v1412_v3, %v1255_v49  ;;  %v1182_v49 = vmul.f32 %v1821_v19, %v603_v22  ;;  %v318_v47 = vld [vmem:[#allocation4 + $0x5b0] sm:$0xff] }
 0x172   :  { %1348 = vadd.xlane.f32.xlu1 %v1173_v7  ;;  %1346 = vadd.xlane.f32.xlu0 %v1172_v57  ;;  %v510_v7 = vld [vmem:[#allocation4 + $0x5b8] sm:$0xff]  ;;  %v604_v57 = vadd.f32 %v508_v32, %v316_v39 }
 0x173   :  { %v1257_v18 = vpop.xlane.xlu2 %1256  ;;  %v606_v13 = vadd.f32 %v510_v7, %v318_v47 }
 0x174   :  { %v1414_v50 = vadd.f32 %v1413_v9, %v1257_v18  ;;  %v1183_v18 = vmul.f32 %v1926_v15, %v604_v57 }
 0x175   :  { %v1261_v14 = vpop.xlane.xlu1 %1260  ;;  %v1259_v20 = vpop.xlane.xlu0 %1258 }
 0x176   :  { %v1415_v34 = vadd.f32 %v1414_v50, %v1259_v20  ;;  %v1185_v50 = vmul.f32 %v1927_v43, %v606_v13  ;;  %v1184_v20 = vmul.f32 %v1928_v63, %v605_v31 }
 0x178   :  { %1350 = vadd.xlane.f32.xlu2 %v1174_v48  ;;  %v1416_v53 = vadd.f32 %v1415_v34, %v1261_v14  ;;  %v511_v14 = vld [vmem:[#allocation4 + $0x5c8] sm:$0xff]  ;;  %v273_v48 = vld [vmem:[#allocation4 + $0x2e0] sm:$0xff] }
 0x17a   :  { %1354 = vadd.xlane.f32.xlu1 %v1176_v16  ;;  %1352 = vadd.xlane.f32.xlu0 %v1175_v23  ;;  %v465_v16 = vld [vmem:[#allocation4 + $0x2e8] sm:$0xff]  ;;  %v607_v23 = vadd.f32 %v511_v14, %v319_v24 }
 0x17b   :  { %v1263_v30 = vpop.xlane.xlu2 %1262  ;;  %v561_v6 = vadd.f32 %v465_v16, %v273_v48 }
 0x17c   :  { %v1417_v25 = vadd.f32 %v1416_v53, %v1263_v30  ;;  %v1929_v30 = vld [vmem:[#allocation8_spill] sm:$0xff] }
 0x17d   :  { %v1267_v60 = vpop.xlane.xlu1 %1266  ;;  %v1265_v12 = vpop.xlane.xlu0 %1264  ;;  %v1186_v61 = vmul.f32 %v1929_v30, %v607_v23 }
 0x17e   :  { %v1418_v5 = vadd.f32 %v1417_v25, %v1265_v12  ;;  %v1930_v25 = vld [vmem:[#allocation12_spill] sm:$0xff] }
 0x17f   :  { %v513_v12 = vld [vmem:[#allocation4 + $0x5e8] sm:$0xff] }
 0x180   :  { %1356 = vadd.xlane.f32.xlu2 %v1177_v27  ;;  %v1419_v35 = vadd.f32 %v1418_v5, %v1267_v60  ;;  %v1140_v60 = vmul.f32 %v1930_v25, %v561_v6  ;;  %v1187_v5 = vmul.f32 %v1842_v1, %v608_v29  ;;  %v322_v27 = vld [vmem:[#allocation4 + $0x5f0] sm:$0xff] }
 0x182   :  { %1360 = vadd.xlane.f32.xlu1 %v1179_v33  ;;  %1358 = vadd.xlane.f32.xlu0 %v1178_v54  ;;  %v514_v33 = vld [vmem:[#allocation4 + $0x5f8] sm:$0xff] }
 0x183   :  { %v1269_v45 = vpop.xlane.xlu2 %1268  ;;  %v610_v40 = vadd.f32 %v514_v33, %v322_v27 }
 0x184   :  { %v1420_v52 = vadd.f32 %v1419_v35, %v1269_v45  ;;  %v609_v35 = vadd.f32 %v513_v12, %v321_v28 }
 0x185   :  { %v1273_v46 = vpop.xlane.xlu1 %1272  ;;  %v1271_v44 = vpop.xlane.xlu0 %1270 }
 0x186   :  { %v1421_v36 = vadd.f32 %v1420_v52, %v1271_v44  ;;  %v1188_v52 = vmul.f32 %v1930_v25, %v609_v35 }
 0x188   :  { %1362 = vadd.xlane.f32.xlu2 %v1180_v56  ;;  %v1422_v3 = vadd.f32 %v1421_v36, %v1273_v46  ;;  %v1931_v46 = vld [vmem:[#allocation11_spill] sm:$0xff] }
 0x189   :  { %v1189_v2 = vmul.f32 %v1931_v46, %v610_v40  ;;  %v1141_v1 = vmul.f32 %v1931_v46, %v562_v0 }
 0x18a   :  { %1366 = vadd.xlane.f32.xlu1 %v1182_v49  ;;  %1364 = vadd.xlane.f32.xlu0 %v1181_v58 }
 0x18b   :  { %v1275_v9 = vpop.xlane.xlu2 %1274 }
 0x18c   :  { %v1423_v8 = vadd.f32 %v1422_v3, %v1275_v9 }
 0x18d   :  { %v1279_v4 = vpop.xlane.xlu1 %1278  ;;  %v1277_v62 = vpop.xlane.xlu0 %1276 }
 0x18e   :  { %v1424_v19 = vadd.f32 %v1423_v8, %v1277_v62 }
 0x190   :  { %1368 = vadd.xlane.f32.xlu2 %v1183_v18  ;;  %v1425_v34 = vadd.f32 %v1424_v19, %v1279_v4 }
 0x192   :  { %1372 = vadd.xlane.f32.xlu1 %v1185_v50  ;;  %1370 = vadd.xlane.f32.xlu0 %v1184_v20 }
 0x193   :  { %v1281_v53 = vpop.xlane.xlu2 %1280 }
 0x194   :  { %v1892_v55 = vadd.f32 %v1425_v34, %v1281_v53 }
 0x195   :  { %v1289_v26 = vpop.xlane.xlu1 %1288  ;;  %v1287_v59 = vpop.xlane.xlu0 %1286 }
 0x196   :  { %v1435_v54 = vadd.f32 %v1289_v26, %v1287_v59 }
 0x198   :  { %1374 = vadd.xlane.f32.xlu2 %v1186_v61 }
 0x19a   :  { %1282 = vadd.xlane.f32.xlu1 %v1140_v60  ;;  %1376 = vadd.xlane.f32.xlu0 %v1187_v5 }
 0x19b   :  { %v1291_v41 = vpop.xlane.xlu2 %1290 }
 0x19c   :  { %v1436_v42 = vadd.f32 %v1435_v54, %v1291_v41 }
 0x19d   :  { %v1295_v51 = vpop.xlane.xlu1 %1294  ;;  %v1293_v45 = vpop.xlane.xlu0 %1292 }
 0x19e   :  { %v1437_v22 = vadd.f32 %v1436_v42, %v1293_v45 }
 0x1a0   :  { %1378 = vadd.xlane.f32.xlu2 %v1188_v52  ;;  %v1438_v44 = vadd.f32 %v1437_v22, %v1295_v51 }
 0x1a2   :  { %1380 = vadd.xlane.f32.xlu1 %v1189_v2  ;;  %1284 = vadd.xlane.f32.xlu0 %v1141_v1 }
 0x1a3   :  { %v1297_v36 = vpop.xlane.xlu2 %1296 }
 0x1a4   :  { %v1439_v56 = vadd.f32 %v1438_v44, %v1297_v36 }
 0x1a5   :  { %v1301_v49 = vpop.xlane.xlu1 %1300  ;;  %v1299_v39 = vpop.xlane.xlu0 %1298 }
 0x1a6   :  { %v1440_v32 = vadd.f32 %v1439_v56, %v1299_v39 }
 0x1a8   :  { %v1441_v58 = vadd.f32 %v1440_v32, %v1301_v49 }
 0x1ab   :  { %v1303_v3 = vpop.xlane.xlu2 %1302 }
 0x1ac   :  { %v1442_v47 = vadd.f32 %v1441_v58, %v1303_v3 }
 0x1ad   :  { %v1307_v7 = vpop.xlane.xlu1 %1306  ;;  %v1305_v10 = vpop.xlane.xlu0 %1304 }
 0x1ae   :  { %v1443_v17 = vadd.f32 %v1442_v47, %v1305_v10 }
 0x1b0   :  { %v1444_v57 = vadd.f32 %v1443_v17, %v1307_v7 }
 0x1b3   :  { %v1309_v9 = vpop.xlane.xlu2 %1308 }
 0x1b4   :  { %v1445_v13 = vadd.f32 %v1444_v57, %v1309_v9 }
 0x1b5   :  { %v1313_v8 = vpop.xlane.xlu1 %1312  ;;  %v1311_v4 = vpop.xlane.xlu0 %1310 }
 0x1b6   :  { %v1446_v31 = vadd.f32 %v1445_v13, %v1311_v4 }
 0x1b8   :  { %v1447_v62 = vadd.f32 %v1446_v31, %v1313_v8 }
 0x1bb   :  { %v1315_v19 = vpop.xlane.xlu2 %1314 }
 0x1bc   :  { %v1448_v15 = vadd.f32 %v1447_v62, %v1315_v19 }
 0x1bd   :  { %v1319_v18 = vpop.xlane.xlu1 %1318  ;;  %v1317_v43 = vpop.xlane.xlu0 %1316 }
 0x1be   :  { %v1449_v50 = vadd.f32 %v1448_v15, %v1317_v43 }
 0x1c0   :  { %v1450_v24 = vadd.f32 %v1449_v50, %v1319_v18 }
 0x1c3   :  { %v1321_v14 = vpop.xlane.xlu2 %1320 }
 0x1c4   :  { %v1451_v63 = vadd.f32 %v1450_v24, %v1321_v14 }
 0x1c5   :  { %v1325_v20 = vpop.xlane.xlu1 %1324  ;;  %v1323_v34 = vpop.xlane.xlu0 %1322 }
 0x1c6   :  { %v1452_v48 = vadd.f32 %v1451_v63, %v1323_v34 }
 0x1c8   :  { %v1453_v16 = vadd.f32 %v1452_v48, %v1325_v20 }
 0x1cb   :  { %v1327_v37 = vpop.xlane.xlu2 %1326 }
 0x1cc   :  { %v1454_v21 = vadd.f32 %v1453_v16, %v1327_v37 }
 0x1cd   :  { %v1331_v23 = vpop.xlane.xlu1 %1330  ;;  %v1329_v53 = vpop.xlane.xlu0 %1328 }
 0x1ce   :  { %v1455_v6 = vadd.f32 %v1454_v21, %v1329_v53 }
 0x1d0   :  { %v1456_v26 = vadd.f32 %v1455_v6, %v1331_v23 }
 0x1d3   :  { %v1333_v29 = vpop.xlane.xlu2 %1332 }
 0x1d4   :  { %v1457_v59 = vadd.f32 %v1456_v26, %v1333_v29 }
 0x1d5   :  { %v1337_v30 = vpop.xlane.xlu1 %1336  ;;  %v1335_v61 = vpop.xlane.xlu0 %1334 }
 0x1d6   :  { %v1458_v25 = vadd.f32 %v1457_v59, %v1335_v61 }
 0x1d8   :  { %v1459_v60 = vadd.f32 %v1458_v25, %v1337_v30 }
 0x1db   :  { %v1339_v28 = vpop.xlane.xlu2 %1338 }
 0x1dc   :  { %v1460_v12 = vadd.f32 %v1459_v60, %v1339_v28 }
 0x1dd   :  { %v1343_v5 = vpop.xlane.xlu1 %1342  ;;  %v1341_v27 = vpop.xlane.xlu0 %1340 }
 0x1de   :  { %v1461_v33 = vadd.f32 %v1460_v12, %v1341_v27 }
 0x1e0   :  { %v1462_v11 = vadd.f32 %v1461_v33, %v1343_v5 }
 0x1e3   :  { %v1345_v38 = vpop.xlane.xlu2 %1344 }
 0x1e4   :  { %v1463_v54 = vadd.f32 %v1462_v11, %v1345_v38 }
 0x1e5   :  { %v1349_v35 = vpop.xlane.xlu1 %1348  ;;  %v1347_v41 = vpop.xlane.xlu0 %1346 }
 0x1e6   :  { %v1464_v40 = vadd.f32 %v1463_v54, %v1347_v41 }
 0x1e8   :  { %v1465_v42 = vadd.f32 %v1464_v40, %v1349_v35 }
 0x1eb   :  { %v1351_v51 = vpop.xlane.xlu2 %1350 }
 0x1ec   :  { %v1466_v0 = vadd.f32 %v1465_v42, %v1351_v51 }
 0x1ed   :  { %v1355_v45 = vpop.xlane.xlu1 %1354  ;;  %v1353_v22 = vpop.xlane.xlu0 %1352 }
 0x1ee   :  { %v1467_v52 = vadd.f32 %v1466_v0, %v1353_v22 }
 0x1f0   :  { %v1468_v46 = vadd.f32 %v1467_v52, %v1355_v45 }
 0x1f3   :  { %v1357_v2 = vpop.xlane.xlu2 %1356 }
 0x1f4   :  { %v1469_v1 = vadd.f32 %v1468_v46, %v1357_v2 }
 0x1f5   :  { %v1361_v44 = vpop.xlane.xlu1 %1360  ;;  %v1359_v36 = vpop.xlane.xlu0 %1358 }
 0x1f6   :  { %v1470_v56 = vadd.f32 %v1469_v1, %v1359_v36 }
 0x1f8   :  { %v1471_v49 = vadd.f32 %v1470_v56, %v1361_v44 }
 0x1fb   :  { %v1363_v39 = vpop.xlane.xlu2 %1362 }
 0x1fc   :  { %v1472_v32 = vadd.f32 %v1471_v49, %v1363_v39 }
 0x1fd   :  { %v1367_v58 = vpop.xlane.xlu1 %1366  ;;  %v1365_v3 = vpop.xlane.xlu0 %1364 }
 0x1fe   :  { %v1473_v47 = vadd.f32 %v1472_v32, %v1365_v3 }
 0x200   :  { %v1474_v7 = vadd.f32 %v1473_v47, %v1367_v58 }
 0x203   :  { %v1369_v10 = vpop.xlane.xlu2 %1368 }
 0x204   :  { %v1475_v17 = vadd.f32 %v1474_v7, %v1369_v10 }
 0x205   :  { %v1373_v57 = vpop.xlane.xlu1 %1372  ;;  %v1371_v9 = vpop.xlane.xlu0 %1370 }
 0x206   :  { %v1476_v13 = vadd.f32 %v1475_v17, %v1371_v9 }
 0x208   :  { %v1477_v4 = vadd.f32 %v1476_v13, %v1373_v57 }
 0x20b   :  { %v1375_v8 = vpop.xlane.xlu2 %1374 }
 0x20c   :  { %v1478_v19 = vadd.f32 %v1477_v4, %v1375_v8 }
 0x20d   :  { %v1283_v31 = vpop.xlane.xlu1 %1282  ;;  %v1377_v62 = vpop.xlane.xlu0 %1376 }
 0x20e   :  { %v1479_v15 = vadd.f32 %v1478_v19, %v1377_v62  ;;  %v1427_v43 = vadd.f32 %v1892_v55, %v1283_v31  ;;  %v1491_v55 = vstv %s1912_s2 }
 0x213   :  { %v1379_v18 = vpop.xlane.xlu2 %1378 }
 0x214   :  { %v1480_v50 = vadd.f32 %v1479_v15, %v1379_v18 }
 0x215   :  { %v1381_v24 = vpop.xlane.xlu1 %1380  ;;  %v1285_v14 = vpop.xlane.xlu0 %1284 }
 0x216   :  { %v1481_v63 = vadd.f32 %v1480_v50, %v1381_v24  ;;  %v1428_v20 = vadd.f32 %v1427_v43, %v1285_v14 }
 0x218   :  { %v1482_v34 = vrot.slane %v1481_v63, 4  ;;  %v1429_v48 = vrot.slane %v1428_v20, 4 }
 0x21a   :  { %v1483_v16 = vadd.f32 %v1482_v34, %v1481_v63  ;;  %v1430_v37 = vadd.f32 %v1429_v48, %v1428_v20 }
 0x21c   :  { %v1484_v21 = vrot.slane %v1483_v16, 2  ;;  %v1431_v23 = vrot.slane %v1430_v37, 2 }
 0x21e   :  { %v1485_v53 = vadd.f32 %v1484_v21, %v1483_v16  ;;  %v1432_v6 = vadd.f32 %v1431_v23, %v1430_v37 }
 0x220   :  { %v1486_v26 = vrot.slane %v1485_v53, 1  ;;  %v1433_v29 = vrot.slane %v1432_v6, 1 }
 0x222   :  { %v1487_v59 = vadd.f32 %v1486_v26, %v1485_v53  ;;  %v1434_v30 = vadd.f32 %v1433_v29, %v1432_v6 }
 0x224   :  { %v1489_v61 = vmul.f32 0.00390625, %v1487_v59  ;;  %v1488_v25 = vmul.f32 0.00390625, %v1434_v30 }
 0x226   :  { %v1493_v60 = vadd.f32 %v1491_v55, %v1489_v61  ;;  %v1492_v28 = vadd.f32 %v1491_v55, %v1488_v25 }
 0x228   :  { %1496 = vst.msk [vmem:[%s1913_s3 + $0x1] sm:$0x1] %vm1494_vm0, %v1493_v60 }
 0x229   :  { %1495 = vst.msk [vmem:[%s1913_s3] sm:$0x1] %vm1494_vm0, %v1492_v28 }
 0x22a   :  { %1501 = vsyncpa [#allocation5], 1 }

</bundles_post_ra>
